<compile_context>
chip_gen: v7x
topology: tpu7x:2x2x1
jax: 0.10.0
libtpu: 0.0.40
codegen_flags: <defaults>
</compile_context>

<pallas_src>
import functools
import math

import jax
import jax.numpy as jnp
from jax.experimental import pallas as pl
from jax.experimental.pallas import tpu as pltpu


def _round_up(a, b):
    return ((a + b - 1) // b) * b


def _cdiv(a, b):
    return (a + b - 1) // b


def _vq_kernel(x_ref, eblk_ref, e2_ref, idx_ref, q_ref, *, num_heads, c_pad):
    """One N-tile of the fused (all-heads) product quantizer.

    x_ref:    (TN, dim)        inputs in natural row-contiguous layout
    eblk_ref: (H*C_pad, dim)   block-diagonal codebook (resident across tiles)
    e2_ref:   (H*C_pad, 1)     0.5*||e||^2 (1e30 on padded codebook rows)
    idx_ref:  (H, TN)          int32 nearest-codeword indices (lane-dense store)
    q_ref:    (TN, dim)        dequantized codewords, natural layout
    """
    x = x_ref[...]                                   # (TN, dim) f32
    eblk = eblk_ref[...]                             # (HC, dim) f32
    e2h = e2_ref[...]                                # (HC, 1)   f32
    tn = x.shape[0]

    # scores[r, n] = x[n].e_blk[r] - 0.5*||e_blk[r]||^2.
    # argmax_c(2 x.e - ||e||^2) == argmax_c(x.e - 0.5||e||^2); the per-row
    # ||x||^2 term is a constant and dropped.  Off-diagonal blocks of E_blk are
    # zero, so row h*C_pad+c only sees head h's slice of x.
    xe = jax.lax.dot_general(eblk, x, (((1,), (1,)), ((), ())),
                             preferred_element_type=jnp.float32)      # (HC, TN) MXU
    scores = xe - e2h                                                  # (HC, TN)

    # One iota, reused for every head's argmax and one-hot (no CSE in JAX).
    iota_c = jax.lax.broadcasted_iota(jnp.int32, (c_pad, tn), 0)

    idx_rows = []
    onehot_rows = []
    for head in range(num_heads):
        s_h = scores[head * c_pad:(head + 1) * c_pad, :]               # (C_pad, TN)
        # First-max argmax over the codebook (sublane) axis using only max/min
        # reductions (matches torch.argmax tie-breaking: lowest index).
        rmax = jnp.max(s_h, axis=0, keepdims=True)                     # (1, TN)
        cand = jnp.where(s_h == rmax, iota_c, jnp.int32(c_pad))
        idx_h = jnp.min(cand, axis=0, keepdims=True)                   # (1, TN)
        idx_rows.append(idx_h)
        onehot_rows.append((iota_c == idx_h).astype(jnp.float32))      # (C_pad, TN)

    idx_ref[...] = jnp.concatenate(idx_rows, axis=0).astype(jnp.int32)  # (H, TN)

    # Dequantize (F.embedding gather) as a single one-hot matmul on the MXU,
    # producing the natural-layout (TN, dim) output tile directly.
    onehot = jnp.concatenate(onehot_rows, axis=0)                      # (HC, TN)
    q_ref[...] = jax.lax.dot_general(onehot, eblk, (((0,), (0,)), ((), ())),
                                     preferred_element_type=jnp.float32)


def _choose_tiling(n, dim, h, hc_pad, tile_n):
    """Pick the N-tile size (multiple of 128) under a VMEM budget."""
    n128 = _round_up(max(n, 1), 128)
    # VMEM bytes per tile column: double-buffered x & q tiles, double-buffered
    # (H, TN) index tile, and ~5 live (HC, TN) f32/i32 intermediates.
    per_col = 4 * (4 * dim + 2 * h + 5 * hc_pad)
    if tile_n is None:
        budget = 24 * 1024 * 1024        # conservative for v7x's 64 MiB VMEM
        cap = max(128, min(32768, (budget // per_col) // 128 * 128))
    else:
        cap = max(128, _round_up(int(tile_n), 128))   # guard: multiple of 128
    cap = min(cap, n128)
    n_tiles = _cdiv(n128, cap)
    tn = _round_up(_cdiv(n128, n_tiles), 128)         # limits per-tile padding waste
    return tn, tn * n_tiles, n_tiles, per_col


def vector_quantizer_forward(x, embeddings, *, tile_n=None, min_n_for_pallas=2048):
    """Forward pass of VectorQuantizer (which_dim=-1 default path).

    x:          (..., dim) float
    embeddings: (num_heads, codebook_size, dim // num_heads) float
    returns (quantization (..., dim), embed_indices (..., num_heads) int32)
    """
    # TODO(synk): which_dim != -1 permute paths not implemented (default path only).
    h, c, d = embeddings.shape
    dim = h * d
    assert x.shape[-1] == dim
    lead = x.shape[:-1]
    n = math.prod(lead) if lead else 1

    if n < min_n_for_pallas:
        # Tiny problems: kernel launch, 128-lane padding and layout plumbing
        # dominate -> plain XLA is faster.
        return _reference_forward(x, embeddings)

    c_pad = _round_up(c, 8)                       # keep per-head sublane slices aligned
    hc = h * c_pad
    tn, n_pad, n_tiles, per_col = _choose_tiling(n, dim, h, hc, tile_n)

    # Block-diagonal codebook (H*C_pad, dim): row h*C_pad+c holds head h's
    # codeword c in columns [h*d, (h+1)*d), zeros elsewhere.
    e = embeddings.astype(jnp.float32)
    if c_pad != c:
        e = jnp.pad(e, ((0, 0), (0, c_pad - c), (0, 0)))
    eye = jnp.eye(h, dtype=jnp.float32)
    e_blk = jnp.einsum("hcd,hg->hcgd", e, eye).reshape(hc, dim)

    # Hoisted 0.5*||e||^2 (padded codebook rows get a huge penalty so they are
    # never selected).
    e2_half = 0.5 * jnp.sum(e * e, axis=-1)                          # (H, C_pad)
    if c_pad != c:
        e2_half = jnp.where(jnp.arange(c_pad)[None, :] < c, e2_half, jnp.float32(1e30))
    e2_half = e2_half.reshape(hc, 1)

    # Natural layout: no HBM transpose of x, just a (free) reshape + tail pad.
    xf = x.reshape(n, dim).astype(jnp.float32)
    if n_pad != n:
        xf = jnp.pad(xf, ((0, n_pad - n), (0, 0)))

    cost = pl.CostEstimate(
        flops=4 * n_pad * hc * dim,                                   # two MXU matmuls
        transcendentals=0,
        bytes_accessed=4 * (2 * n_pad * dim + n_pad * h + hc * (dim + 1)),
    )
    vmem_limit = int(min(64 * 1024 * 1024,
                         max(per_col * tn + 4 * hc * (dim + 1) + (2 << 20),
                             16 * 1024 * 1024)))

    kernel = functools.partial(_vq_kernel, num_heads=h, c_pad=c_pad)
    idx_t, q_flat = pl.pallas_call(
        kernel,
        grid=(n_tiles,),
        in_specs=[
            pl.BlockSpec((tn, dim), lambda j: (j, 0)),    # x tile (natural layout)
            pl.BlockSpec((hc, dim), lambda j: (0, 0)),    # block-diag codebook (resident)
            pl.BlockSpec((hc, 1), lambda j: (0, 0)),      # 0.5*||e||^2 (resident)
        ],
        out_specs=[
            pl.BlockSpec((h, tn), lambda j: (0, j)),      # indices, lane-dense over N
            pl.BlockSpec((tn, dim), lambda j: (j, 0)),    # dequant, natural layout
        ],
        out_shape=(
            jax.ShapeDtypeStruct((h, n_pad), jnp.int32),
            jax.ShapeDtypeStruct((n_pad, dim), jnp.float32),
        ),
        compiler_params=pltpu.CompilerParams(
            dimension_semantics=("parallel",),            # shards tiles across v7x's 2 TCs
            vmem_limit_bytes=vmem_limit,
        ),
        cost_estimate=cost,
    )(xf, e_blk, e2_half)

    # torch.stack([per-head indices], dim=-1) -> (..., H)
    embed_indices = idx_t[:, :n].T.reshape(*lead, h)
    # torch.cat([per-head dequant], dim=-1) -> (..., dim)
    quantization = q_flat[:n].reshape(*lead, dim).astype(x.dtype)
    return quantization, embed_indices


def _reference_forward(x, embeddings):
    """Pure-JAX reference matching the PyTorch semantics (full distance)."""
    h, c, d = embeddings.shape
    lead = x.shape[:-1]
    n = math.prod(lead) if lead else 1
    xh = x.reshape(n, h, d).astype(jnp.float32).transpose(1, 0, 2)     # (H, N, d)
    e = embeddings.astype(jnp.float32)
    x2 = jnp.sum(xh * xh, axis=-1, keepdims=True)                      # (H, N, 1)
    e2 = jnp.sum(e * e, axis=-1)[:, None, :]                           # (H, 1, C)
    xe = jnp.einsum("hnd,hcd->hnc", xh, e)
    dist = -(x2 - 2.0 * xe + e2)
    idx = jnp.argmax(dist, axis=-1)                                    # (H, N)
    quant = jnp.take_along_axis(e, idx[:, :, None], axis=1)            # (H, N, d)
    embed_indices = idx.transpose(1, 0).reshape(*lead, h).astype(jnp.int32)
    quantization = quant.transpose(1, 0, 2).reshape(*lead, h * d).astype(x.dtype)
    return quantization, embed_indices


if __name__ == "__main__":
    # Module config: VectorQuantizer(dim=32, num_heads=4, codebook_size=16).
    B, S, DIM, HEADS, CODEBOOK = 2, 8, 32, 4, 16
    HEAD_DIM = DIM // HEADS

    key = jax.random.PRNGKey(0)
    kx, ke, kx2 = jax.random.split(key, 3)
    x = jax.random.normal(kx, (B, S, DIM), dtype=jnp.float32)
    # Deterministic stand-in for each head's nn.Parameter torch.randn(C, head_dim).
    embeddings = jax.random.normal(ke, (HEADS, CODEBOOK, HEAD_DIM), dtype=jnp.float32)

    # 1) Tiny module-consistent shape, forced through the Pallas path.
    fwd_small = jax.jit(functools.partial(vector_quantizer_forward, min_n_for_pallas=0))
    quantization, embed_indices = fwd_small(x, embeddings)
    jax.block_until_ready((quantization, embed_indices))
    q_ref, i_ref = _reference_forward(x, embeddings)
    assert quantization.shape == (B, S, DIM)
    assert embed_indices.shape == (B, S, HEADS)
    assert jnp.array_equal(embed_indices, i_ref)
    assert jnp.allclose(quantization, q_ref, atol=1e-5, rtol=1e-5)

    # 2) Multi-tile grid with a padded tail (N=600 -> 3 tiles of 256).
    x2 = jax.random.normal(kx2, (2, 300, DIM), dtype=jnp.float32)
    fwd_multi = jax.jit(functools.partial(vector_quantizer_forward,
                                          tile_n=256, min_n_for_pallas=0))
    q2, i2 = fwd_multi(x2, embeddings)
    jax.block_until_ready((q2, i2))
    q2_ref, i2_ref = _reference_forward(x2, embeddings)
    assert jnp.array_equal(i2, i2_ref)
    assert jnp.allclose(q2, q2_ref, atol=1e-5, rtol=1e-5)

    # 3) Default dispatch at tiny N takes the XLA fallback and must agree too.
    q3, i3 = jax.jit(vector_quantizer_forward)(x, embeddings)
    jax.block_until_ready((q3, i3))
    assert jnp.array_equal(i3, i_ref)
    assert jnp.allclose(q3, q_ref, atol=1e-5, rtol=1e-5)

    print("KERNEL_OK")
</pallas_src>

<mosaic_0001>
module attributes {stable_mosaic.version = 11 : i64} {
  func.func @_vq_kernel(%arg0: i32, %arg1: memref<128x32xf32, #tpu.memory_space<vmem>>, %arg2: memref<64x32xf32, #tpu.memory_space<vmem>>, %arg3: memref<64x1xf32, #tpu.memory_space<vmem>>, %arg4: memref<4x128xi32, #tpu.memory_space<vmem>>, %arg5: memref<128x32xf32, #tpu.memory_space<vmem>>) attributes {dimension_semantics = [#tpu.dimension_semantics<parallel>], iteration_bounds = array<i64: 1>, scalar_prefetch = 0 : i64, scratch_operands = 0 : i64, tpu.core_type = #tpu.core_type<tc>, window_params = [{transform_indices = @transform_0, window_bounds = array<i64: 128, 32>}, {pipeline_mode = #tpu.pipeline_mode<synchronous>, transform_indices = @transform_1, window_bounds = array<i64: 64, 32>}, {pipeline_mode = #tpu.pipeline_mode<synchronous>, transform_indices = @transform_2, window_bounds = array<i64: 64, 1>}, {transform_indices = @transform_3, window_bounds = array<i64: 4, 128>}, {transform_indices = @transform_4, window_bounds = array<i64: 128, 32>}]} {
    %c0 = arith.constant 0 : index
    %c0_0 = arith.constant 0 : index
    %0 = vector.load %arg1[%c0, %c0_0] : memref<128x32xf32, #tpu.memory_space<vmem>>, vector<128x32xf32>
    %c0_1 = arith.constant 0 : index
    %c0_2 = arith.constant 0 : index
    %1 = vector.load %arg2[%c0_1, %c0_2] : memref<64x32xf32, #tpu.memory_space<vmem>>, vector<64x32xf32>
    %c0_3 = arith.constant 0 : index
    %c0_4 = arith.constant 0 : index
    %2 = vector.load %arg3[%c0_3, %c0_4] : memref<64x1xf32, #tpu.memory_space<vmem>>, vector<64x1xf32>
    %cst = arith.constant dense<0.000000e+00> : vector<64x128xf32>
    %3 = tpu.matmul %1, %0, %cst {dimension_numbers = #tpu.dot_dimension_numbers<[1], [1], [0], [0], [0, 0, 1, 0], [], []>} : vector<64x32xf32>, vector<128x32xf32>, vector<64x128xf32> -> vector<64x128xf32>
    %4 = vector.broadcast %2 : vector<64x1xf32> to vector<64x128xf32>
    %5 = arith.subf %3, %4 : vector<64x128xf32>
    %6 = tpu.iota {dimensions = array<i32: 0>} : vector<16x128xi32>
    %7 = vector.extract_strided_slice %5 {offsets = [0, 0], sizes = [16, 128], strides = [1, 1]} : vector<64x128xf32> to vector<16x128xf32>
    %cst_5 = arith.constant dense<0xFF800000> : vector<128xf32>
    %8 = vector.multi_reduction <maximumf>, %7, %cst_5 [0] : vector<16x128xf32> to vector<128xf32>
    %9 = vector.shape_cast %8 : vector<128xf32> to vector<1x128xf32>
    %10 = vector.broadcast %9 : vector<1x128xf32> to vector<16x128xf32>
    %11 = arith.cmpf oeq, %7, %10 : vector<16x128xf32>
    %c16_i32 = arith.constant 16 : i32
    %12 = vector.broadcast %c16_i32 : i32 to vector<16x128xi32>
    %13 = arith.select %11, %6, %12 : vector<16x128xi1>, vector<16x128xi32>
    %cst_6 = arith.constant dense<2147483647> : vector<128xi32>
    %14 = vector.multi_reduction <minsi>, %13, %cst_6 [0] : vector<16x128xi32> to vector<128xi32>
    %15 = vector.shape_cast %14 : vector<128xi32> to vector<1x128xi32>
    %16 = vector.broadcast %15 : vector<1x128xi32> to vector<16x128xi32>
    %17 = arith.cmpi eq, %6, %16 : vector<16x128xi32>
    %18 = arith.extui %17 : vector<16x128xi1> to vector<16x128xi32>
    %19 = arith.sitofp %18 : vector<16x128xi32> to vector<16x128xf32>
    %20 = vector.extract_strided_slice %5 {offsets = [16, 0], sizes = [16, 128], strides = [1, 1]} : vector<64x128xf32> to vector<16x128xf32>
    %cst_7 = arith.constant dense<0xFF800000> : vector<128xf32>
    %21 = vector.multi_reduction <maximumf>, %20, %cst_7 [0] : vector<16x128xf32> to vector<128xf32>
    %22 = vector.shape_cast %21 : vector<128xf32> to vector<1x128xf32>
    %23 = vector.broadcast %22 : vector<1x128xf32> to vector<16x128xf32>
    %24 = arith.cmpf oeq, %20, %23 : vector<16x128xf32>
    %c16_i32_8 = arith.constant 16 : i32
    %25 = vector.broadcast %c16_i32_8 : i32 to vector<16x128xi32>
    %26 = arith.select %24, %6, %25 : vector<16x128xi1>, vector<16x128xi32>
    %cst_9 = arith.constant dense<2147483647> : vector<128xi32>
    %27 = vector.multi_reduction <minsi>, %26, %cst_9 [0] : vector<16x128xi32> to vector<128xi32>
    %28 = vector.shape_cast %27 : vector<128xi32> to vector<1x128xi32>
    %29 = vector.broadcast %28 : vector<1x128xi32> to vector<16x128xi32>
    %30 = arith.cmpi eq, %6, %29 : vector<16x128xi32>
    %31 = arith.extui %30 : vector<16x128xi1> to vector<16x128xi32>
    %32 = arith.sitofp %31 : vector<16x128xi32> to vector<16x128xf32>
    %33 = vector.extract_strided_slice %5 {offsets = [32, 0], sizes = [16, 128], strides = [1, 1]} : vector<64x128xf32> to vector<16x128xf32>
    %cst_10 = arith.constant dense<0xFF800000> : vector<128xf32>
    %34 = vector.multi_reduction <maximumf>, %33, %cst_10 [0] : vector<16x128xf32> to vector<128xf32>
    %35 = vector.shape_cast %34 : vector<128xf32> to vector<1x128xf32>
    %36 = vector.broadcast %35 : vector<1x128xf32> to vector<16x128xf32>
    %37 = arith.cmpf oeq, %33, %36 : vector<16x128xf32>
    %c16_i32_11 = arith.constant 16 : i32
    %38 = vector.broadcast %c16_i32_11 : i32 to vector<16x128xi32>
    %39 = arith.select %37, %6, %38 : vector<16x128xi1>, vector<16x128xi32>
    %cst_12 = arith.constant dense<2147483647> : vector<128xi32>
    %40 = vector.multi_reduction <minsi>, %39, %cst_12 [0] : vector<16x128xi32> to vector<128xi32>
    %41 = vector.shape_cast %40 : vector<128xi32> to vector<1x128xi32>
    %42 = vector.broadcast %41 : vector<1x128xi32> to vector<16x128xi32>
    %43 = arith.cmpi eq, %6, %42 : vector<16x128xi32>
    %44 = arith.extui %43 : vector<16x128xi1> to vector<16x128xi32>
    %45 = arith.sitofp %44 : vector<16x128xi32> to vector<16x128xf32>
    %46 = vector.extract_strided_slice %5 {offsets = [48, 0], sizes = [16, 128], strides = [1, 1]} : vector<64x128xf32> to vector<16x128xf32>
    %cst_13 = arith.constant dense<0xFF800000> : vector<128xf32>
    %47 = vector.multi_reduction <maximumf>, %46, %cst_13 [0] : vector<16x128xf32> to vector<128xf32>
    %48 = vector.shape_cast %47 : vector<128xf32> to vector<1x128xf32>
    %49 = vector.broadcast %48 : vector<1x128xf32> to vector<16x128xf32>
    %50 = arith.cmpf oeq, %46, %49 : vector<16x128xf32>
    %c16_i32_14 = arith.constant 16 : i32
    %51 = vector.broadcast %c16_i32_14 : i32 to vector<16x128xi32>
    %52 = arith.select %50, %6, %51 : vector<16x128xi1>, vector<16x128xi32>
    %cst_15 = arith.constant dense<2147483647> : vector<128xi32>
    %53 = vector.multi_reduction <minsi>, %52, %cst_15 [0] : vector<16x128xi32> to vector<128xi32>
    %54 = vector.shape_cast %53 : vector<128xi32> to vector<1x128xi32>
    %55 = vector.broadcast %54 : vector<1x128xi32> to vector<16x128xi32>
    %56 = arith.cmpi eq, %6, %55 : vector<16x128xi32>
    %57 = arith.extui %56 : vector<16x128xi1> to vector<16x128xi32>
    %58 = arith.sitofp %57 : vector<16x128xi32> to vector<16x128xf32>
    %59 = tpu.concatenate %15, %28, %41, %54 in 0 : vector<1x128xi32>, vector<1x128xi32>, vector<1x128xi32>, vector<1x128xi32> -> vector<4x128xi32>
    %c0_16 = arith.constant 0 : index
    %c0_17 = arith.constant 0 : index
    %60 = vector.load %arg4[%c0_16, %c0_17] : memref<4x128xi32, #tpu.memory_space<vmem>>, vector<4x128xi32>
    tpu.vector_store %arg4[%c0_16, %c0_17], %59 {strides = array<i32>} : memref<4x128xi32, #tpu.memory_space<vmem>>, vector<4x128xi32>,
    %61 = tpu.concatenate %19, %32, %45, %58 in 0 : vector<16x128xf32>, vector<16x128xf32>, vector<16x128xf32>, vector<16x128xf32> -> vector<64x128xf32>
    %cst_18 = arith.constant dense<0.000000e+00> : vector<128x32xf32>
    %62 = tpu.matmul %61, %1, %cst_18 {dimension_numbers = #tpu.dot_dimension_numbers<[0], [0], [1], [1], [0, 1, 1, 1], [], []>} : vector<64x128xf32>, vector<64x32xf32>, vector<128x32xf32> -> vector<128x32xf32>
    %c0_19 = arith.constant 0 : index
    %c0_20 = arith.constant 0 : index
    %63 = vector.load %arg5[%c0_19, %c0_20] : memref<128x32xf32, #tpu.memory_space<vmem>>, vector<128x32xf32>
    tpu.vector_store %arg5[%c0_19, %c0_20], %62 {strides = array<i32>} : memref<128x32xf32, #tpu.memory_space<vmem>>, vector<128x32xf32>,
    return
  }
  func.func @transform_0(%arg0: i32) -> (i32, i32) {
    %c0_i32 = arith.constant 0 : i32
    %c0_i32_0 = arith.constant 0 : i32
    return %arg0, %c0_i32 : i32, i32
  }
  func.func @transform_1(%arg0: i32) -> (i32, i32) {
    %c0_i32 = arith.constant 0 : i32
    %c0_i32_0 = arith.constant 0 : i32
    %c0_i32_1 = arith.constant 0 : i32
    return %c0_i32, %c0_i32_0 : i32, i32
  }
  func.func @transform_2(%arg0: i32) -> (i32, i32) {
    %c0_i32 = arith.constant 0 : i32
    %c0_i32_0 = arith.constant 0 : i32
    %c0_i32_1 = arith.constant 0 : i32
    return %c0_i32, %c0_i32_0 : i32, i32
  }
  func.func @transform_3(%arg0: i32) -> (i32, i32) {
    %c0_i32 = arith.constant 0 : i32
    %c0_i32_0 = arith.constant 0 : i32
    return %c0_i32, %arg0 : i32, i32
  }
  func.func @transform_4(%arg0: i32) -> (i32, i32) {
    %c0_i32 = arith.constant 0 : i32
    %c0_i32_0 = arith.constant 0 : i32
    return %arg0, %c0_i32 : i32, i32
  }
}

</mosaic_0001>

<bundles_post_ra>
// kernel: vector_quantizer_forward.1
= control target key start
LH: loop header
LB: loop body
LE: loop exit
PB: predicated region body
PF: predicated region fallthrough
CT: control target
= control target key end

     0   :  { %vm48_vm0 = vcmask 261120   ;;  %v894_v3 = vmov 0   ;;  %v274_v61 = vlaneseq  ;;  %s1179_s0 = inlined_call_operand.vmem [shape: f32[128,32], index: 0, kind: input, shape index: {}]   ;;  %s1180_s1 = inlined_call_operand.vmem [shape: f32[64,32], index: 1, kind: input, shape index: {}]   ;;  %s1181_s2 = inlined_call_operand.vmem [shape: f32[64,1], index: 2, kind: input, shape index: {}]   ;;  %s1182_s3 = inlined_call_operand.vmem [shape: s32[4,128], index: 3, kind: output, shape index: {0}]   ;;  %s1183_s4 = inlined_call_operand.vmem [shape: f32[128,32], index: 4, kind: output, shape index: {1}]  }
   0x1   :  { %v16_v0 = vld [vmem:[%s1179_s0] sm:$0xff]  ;;  %v17_v1 = vld [vmem:[%s1179_s0 + $0x8] sm:$0xff]  ;;  %vm929_vm1 = vmpackc.low %vm48_vm0, %vm48_vm0  ;;  %892 = vset.pattern.permute.xlu0 %v894_v3  ;;  %893 = vset.pattern.permute.xlu1 %v894_v3 }
   0x2   :  { %v826_v4 = vpack.c.bf16 %v17_v1, %v16_v0  ;;  %v18_v5 = vld [vmem:[%s1179_s0 + $0x10] sm:$0xff]  ;;  %v19_v6 = vld [vmem:[%s1179_s0 + $0x18] sm:$0xff]  ;;  %v948_v8 = vld [vmem:[%s1180_s1] sm:$0xff] }
   0x3   :  { %v832_v7 = vpack.c.bf16 %v19_v6, %v18_v5  ;;  %v20_v9 = vld [vmem:[%s1179_s0 + $0x20] sm:$0xff]  ;;  %v21_v10 = vld [vmem:[%s1179_s0 + $0x28] sm:$0xff]  ;;  %774 = vmatprep.mubr.msk.f32.mxu0 %vm48_vm0, %v948_v8  ;;  %v42_v13 = vld [vmem:[%s1181_s2 + $0x10] sm:$0xff]  ;;  %v1073_v6 = vshrl.u32 %v274_v61, 7 }
   0x4   :  { %828 = vmatprep.subr.msk.bf16.mxu0 %vm929_vm1, %v826_v4  ;;  %v40_v11 = vld [vmem:[%s1181_s2] sm:$0xff]  ;;  %v838_v12 = vpack.c.bf16 %v21_v10, %v20_v9  ;;  %v41_v14 = vld [vmem:[%s1181_s2 + $0x8] sm:$0xff]  ;;  %238 = vperm.xlu1 %893, %v42_v13   ;;  %v43_v15 = vld [vmem:[%s1181_s2 + $0x18] sm:$0xff] }
   0x5   :  { %831 = vmatpush3.bf16.xpose.msk.msra.mxu0 %vm929_vm1, %v826_v4  ;;  %228 = vperm.xlu0 %892, %v40_v11   ;;  %v22_v16 = vld [vmem:[%s1179_s0 + $0x30] sm:$0xff]  ;;  %v23_v17 = vld [vmem:[%s1179_s0 + $0x38] sm:$0xff]  ;;  %v44_v18 = vld [vmem:[%s1181_s2 + $0x20] sm:$0xff] }
   0x6   :  { %834 = vmatprep.subr.msk.bf16.mxu0 %vm929_vm1, %v832_v7  ;;  %v45_v19 = vld [vmem:[%s1181_s2 + $0x28] sm:$0xff]  ;;  %v844_v20 = vpack.c.bf16 %v23_v17, %v22_v16  ;;  %v46_v21 = vld [vmem:[%s1181_s2 + $0x30] sm:$0xff]  ;;  %v47_v22 = vld [vmem:[%s1181_s2 + $0x38] sm:$0xff] }
   0x7   :  { %v24_v23 = vld [vmem:[%s1179_s0 + $0x40] sm:$0xff]  ;;  %v25_v24 = vld [vmem:[%s1179_s0 + $0x48] sm:$0xff]  ;;  %v26_v26 = vld [vmem:[%s1179_s0 + $0x50] sm:$0xff] }
   0x8   :  { %243 = vperm.xlu1 %893, %v43_v15   ;;  %v850_v25 = vpack.c.bf16 %v25_v24, %v24_v23  ;;  %v27_v27 = vld [vmem:[%s1179_s0 + $0x58] sm:$0xff]  ;;  %v28_v29 = vld [vmem:[%s1179_s0 + $0x60] sm:$0xff]  ;;  %v29_v30 = vld [vmem:[%s1179_s0 + $0x68] sm:$0xff] }
   0x9   :  { %233 = vperm.xlu0 %892, %v41_v14   ;;  %v856_v28 = vpack.c.bf16 %v27_v27, %v26_v26  ;;  %v862_v31 = vpack.c.bf16 %v29_v30, %v28_v29  ;;  %v30_v32 = vld [vmem:[%s1179_s0 + $0x70] sm:$0xff]  ;;  %v31_v33 = vld [vmem:[%s1179_s0 + $0x78] sm:$0xff]  ;;  %v33_v35 = vld [vmem:[%s1180_s1 + $0x8] sm:$0xff] }
   0xa   :  { %v868_v34 = vpack.c.bf16 %v31_v33, %v30_v32  ;;  %v34_v36 = vld [vmem:[%s1180_s1 + $0x10] sm:$0xff]  ;;  %v35_v37 = vld [vmem:[%s1180_s1 + $0x18] sm:$0xff]  ;;  %v36_v38 = vld [vmem:[%s1180_s1 + $0x20] sm:$0xff]  ;;  %v874_v42 = vpack.c.bf16 %v33_v35, %v948_v8 }
   0xb   :  { %v37_v39 = vld [vmem:[%s1180_s1 + $0x28] sm:$0xff]  ;;  %v1060_v40 = vld [vmem:[%s1180_s1 + $0x30] sm:$0xff]  ;;  %v1068_v41 = vld [vmem:[%s1180_s1 + $0x38] sm:$0xff]  ;;  %v878_v43 = vpack.c.bf16 %v35_v37, %v34_v36 }
   0xc   :  { %253 = vperm.xlu1 %893, %v45_v19   ;;  %875 = vmatprep.subr.bf16.mxu1 %v874_v42  ;;  %v882_v44 = vpack.c.bf16 %v37_v39, %v36_v38  ;;  %v1076_v19 = vadd.s32 8, %v1073_v6 }
   0xd   :  { %837 = vmatpush3.bf16.xpose.msk.msra.mxu0 %vm929_vm1, %v832_v7  ;;  %248 = vperm.xlu0 %892, %v44_v18  }
   0xe   :  { %840 = vmatprep.subr.msk.bf16.mxu0 %vm929_vm1, %v838_v12  ;;  %877 = vmatpush3.bf16.msra.mxu1 %v874_v42 }
   0xf   :  { %879 = vmatprep.subr.bf16.mxu1 %v878_v43 }
  0x10   :  { %263 = vperm.xlu1 %893, %v47_v22  }
  0x11   :  { %258 = vperm.xlu0 %892, %v46_v21  }
  0x12   :  { %881 = vmatpush3.bf16.msra.mxu1 %v878_v43 }
  0x13   :  { %883 = vmatprep.subr.bf16.mxu1 %v882_v44 }
  0x15   :  { %843 = vmatpush3.bf16.xpose.msk.msra.mxu0 %vm929_vm1, %v838_v12 }
  0x16   :  { %846 = vmatprep.subr.msk.bf16.mxu0 %vm929_vm1, %v844_v20  ;;  %885 = vmatpush3.bf16.msra.mxu1 %v882_v44 }
  0x1d   :  { %849 = vmatpush3.bf16.xpose.msk.msra.mxu0 %vm929_vm1, %v844_v20 }
  0x1e   :  { %852 = vmatprep.subr.msk.bf16.mxu0 %vm929_vm1, %v850_v25 }
  0x25   :  { %855 = vmatpush3.bf16.xpose.msk.msra.mxu0 %vm929_vm1, %v850_v25 }
  0x26   :  { %858 = vmatprep.subr.msk.bf16.mxu0 %vm929_vm1, %v856_v28 }
  0x2d   :  { %861 = vmatpush3.bf16.xpose.msk.msra.mxu0 %vm929_vm1, %v856_v28 }
  0x2e   :  { %864 = vmatprep.subr.msk.bf16.mxu0 %vm929_vm1, %v862_v31 }
  0x35   :  { %867 = vmatpush3.bf16.xpose.msk.msra.mxu0 %vm929_vm1, %v862_v31 }
  0x36   :  { %870 = vmatprep.subr.msk.bf16.mxu0 %vm929_vm1, %v868_v34 }
  0x3d   :  { %873 = vmatpush3.bf16.xpose.msk.msra.mxu0 %vm929_vm1, %v868_v34 }
  0x44   :  { %775 = vmatmul.mubr.msk.f32.vlgmr.msra.gmra.mrb[0].mxu0 %vm48_vm0, %v33_v35 }
  0x45   :  { %777 = vmatprep.mubr.msk.f32.mxu0 %vm48_vm0, %v34_v36 }
  0x48   :  { %778 = vmatmul.mubr.msk.f32.gmra.mrb[2].mxu0 %vm48_vm0, %v35_v37 }
  0x49   :  { %780 = vmatprep.mubr.msk.f32.mxu0 %vm48_vm0, %v36_v38 }
  0x4c   :  { %781 = vmatmul.mubr.msk.f32.gmra.mrb[4].mxu0 %vm48_vm0, %v37_v39 }
  0x4d   :  { %783 = vmatprep.mubr.msk.f32.mxu0 %vm48_vm0, %v1060_v40 }
  0x50   :  { %784 = vmatmul.mubr.msk.f32.gmra.mrb[6].mxu0 %vm48_vm0, %v1068_v41 }
  0x83   :  { %v239_v46 = vpop.permute.xlu1 %238 }
  0x84   :  { %v229_v45 = vpop.permute.xlu0 %228 }
  0x87   :  { %v244_v48 = vpop.permute.xlu1 %243 }
  0x88   :  { %v234_v47 = vpop.permute.xlu0 %233 }
  0x8b   :  { %v254_v57 = vpop.permute.xlu1 %253 }
  0x8c   :  { %v249_v60 = vpop.permute.xlu0 %248 }
  0x8f   :  { %v264_v8 = vpop.permute.xlu1 %263 }
  0x90   :  { %v259_v12 = vpop.permute.xlu0 %258 }
 0x117   :  { %v776_v49 = vpop.f32.mrb[0].mxu0 }
 0x118   :  { %v267_v50 = vsub.f32 %v776_v49, %v234_v47  ;;  %v187_v51 = vpop.f32.mrb[1].mxu0 }
 0x119   :  { %v266_v52 = vsub.f32 %v187_v51, %v229_v45 }
 0x11b   :  { %v277_v53 = vmax.f32 %v266_v52, %v267_v50  ;;  %v779_v54 = vpop.f32.mrb[2].mxu0 }
 0x11c   :  { %v269_v55 = vsub.f32 %v779_v54, %v244_v48  ;;  %v197_v56 = vpop.f32.mrb[3].mxu0 }
 0x11d   :  { %v278_v58 = vrot.slane %v277_v53, 4  ;;  %v268_v59 = vsub.f32 %v197_v56, %v239_v46 }
 0x11f   :  { %v279_v62 = vmax.f32 %v277_v53, %v278_v58  ;;  %v305_v63 = vmax.f32 %v268_v59, %v269_v55  ;;  %v782_v0 = vpop.f32.mrb[4].mxu0 }
 0x120   :  { %v271_v1 = vsub.f32 %v782_v0, %v254_v57  ;;  %v207_v2 = vpop.f32.mrb[5].mxu0 }
 0x121   :  { %v280_v3 = vrot.slane %v279_v62, 2  ;;  %v306_v4 = vrot.slane %v305_v63, 4  ;;  %v270_v5 = vsub.f32 %v207_v2, %v249_v60 }
 0x123   :  { %v281_v7 = vmax.f32 %v279_v62, %v280_v3  ;;  %v307_v9 = vmax.f32 %v305_v63, %v306_v4  ;;  %v333_v10 = vmax.f32 %v270_v5, %v271_v1  ;;  %v785_v11 = vpop.f32.mrb[6].mxu0 }
 0x124   :  { %v273_v13 = vsub.f32 %v785_v11, %v264_v8  ;;  %v217_v14 = vpop.f32.mrb[7].mxu0 }
 0x125   :  { %v282_v15 = vrot.slane %v281_v7, 1  ;;  %v308_v16 = vrot.slane %v307_v9, 2  ;;  %v334_v17 = vrot.slane %v333_v10, 4  ;;  %v272_v18 = vsub.f32 %v217_v14, %v259_v12 }
 0x127   :  { %v283_v20 = vmax.f32 %v281_v7, %v282_v15  ;;  %v309_v21 = vmax.f32 %v307_v9, %v308_v16  ;;  %v335_v22 = vmax.f32 %v333_v10, %v334_v17  ;;  %v361_v23 = vmax.f32 %v272_v18, %v273_v13 }
 0x129   :  { %vm284_vm2 = vcmp.eq.f32.partialorder %v266_v52, %v283_v20  ;;  %vm285_vm3 = vcmp.eq.f32.partialorder %v267_v50, %v283_v20  ;;  %v310_v24 = vrot.slane %v309_v21, 1  ;;  %v336_v25 = vrot.slane %v335_v22, 2 }
 0x12a   :  { %v286_v26 = vsel %vm284_vm2, %v1073_v6, 16  ;;  %v287_v27 = vsel %vm285_vm3, %v1076_v19, 16  ;;  %v362_v28 = vrot.slane %v361_v23, 4 }
 0x12b   :  { %vm288_vm4 = vcmp.lt.s32.totalorder %v286_v26, %v287_v27  ;;  %v311_v29 = vmax.f32 %v309_v21, %v310_v24  ;;  %v337_v30 = vmax.f32 %v335_v22, %v336_v25 }
 0x12c   :  { %v289_v31 = vsel %vm288_vm4, %v286_v26, %v287_v27  ;;  %v363_v32 = vmax.f32 %v361_v23, %v362_v28 }
 0x12d   :  { %v290_v33 = vrot.slane %v289_v31, 4  ;;  %vm312_vm5 = vcmp.eq.f32.partialorder %v268_v59, %v311_v29  ;;  %vm313_vm6 = vcmp.eq.f32.partialorder %v269_v55, %v311_v29  ;;  %v338_v34 = vrot.slane %v337_v30, 1 }
 0x12e   :  { %v314_v35 = vsel %vm312_vm5, %v1073_v6, 16  ;;  %v315_v36 = vsel %vm313_vm6, %v1076_v19, 16  ;;  %v364_v37 = vrot.slane %v363_v32, 2  ;;  %vm389_vm6 = vcmask 1040384  }
 0x12f   :  { %vm291_vm7 = vcmp.lt.s32.totalorder %v289_v31, %v290_v33  ;;  %vm316_vm8 = vcmp.lt.s32.totalorder %v314_v35, %v315_v36  ;;  %v339_v38 = vmax.f32 %v337_v30, %v338_v34 }
 0x130   :  { %v292_v39 = vsel %vm291_vm7, %v289_v31, %v290_v33  ;;  %v317_v42 = vsel %vm316_vm8, %v314_v35, %v315_v36  ;;  %v365_v43 = vmax.f32 %v363_v32, %v364_v37 }
 0x131   :  { %v293_v44 = vrot.slane %v292_v39, 2  ;;  %v318_v45 = vrot.slane %v317_v42, 4  ;;  %vm340_vm9 = vcmp.eq.f32.partialorder %v270_v5, %v339_v38  ;;  %vm341_vm10 = vcmp.eq.f32.partialorder %v271_v1, %v339_v38 }
 0x132   :  { %v342_v46 = vsel %vm340_vm9, %v1073_v6, 16  ;;  %v343_v47 = vsel %vm341_vm10, %v1076_v19, 16  ;;  %v366_v48 = vrot.slane %v365_v43, 1  ;;  %v895_v1 = vmov 0.0  }
 0x133   :  { %vm319_vm11 = vcmp.lt.s32.totalorder %v317_v42, %v318_v45  ;;  %vm344_vm12 = vcmp.lt.s32.totalorder %v342_v46, %v343_v47  ;;  %vm294_vm13 = vcmp.lt.s32.totalorder %v292_v39, %v293_v44  ;;  %v886_v5 = vpack.c.bf16 %v1068_v41, %v1060_v40 }
 0x134   :  { %v320_v49 = vsel %vm319_vm11, %v317_v42, %v318_v45  ;;  %v345_v50 = vsel %vm344_vm12, %v342_v46, %v343_v47  ;;  %v367_v51 = vmax.f32 %v365_v43, %v366_v48  ;;  %v295_v52 = vsel %vm294_vm13, %v292_v39, %v293_v44 }
 0x135   :  { %v321_v53 = vrot.slane %v320_v49, 2  ;;  %v346_v54 = vrot.slane %v345_v50, 4  ;;  %v296_v55 = vrot.slane %v295_v52, 1  ;;  %887 = vmatprep.subr.bf16.mxu1 %v886_v5  ;;  %vm391_vm11 = vcmask 1041408  }
 0x136   :  { %vm368_vm14 = vcmp.eq.f32.partialorder %v272_v18, %v367_v51  ;;  %vm369_vm15 = vcmp.eq.f32.partialorder %v273_v13, %v367_v51  ;;  %889 = vmatpush3.bf16.msra.mxu1 %v886_v5 }
 0x137   :  { %vm322_vm1 = vcmp.lt.s32.totalorder %v320_v49, %v321_v53  ;;  %vm347_vm2 = vcmp.lt.s32.totalorder %v345_v50, %v346_v54  ;;  %v370_v56 = vsel %vm368_vm14, %v1073_v6, 16  ;;  %v371_v57 = vsel %vm369_vm15, %v1076_v19, 16 }
 0x138   :  { %v348_v58 = vsel %vm347_vm2, %v345_v50, %v346_v54  ;;  %vm372_vm3 = vcmp.lt.s32.totalorder %v370_v56, %v371_v57  ;;  %vm297_vm4 = vcmp.lt.s32.totalorder %v295_v52, %v296_v55  ;;  %v323_v59 = vsel %vm322_vm1, %v320_v49, %v321_v53 }
 0x139   :  { %v349_v60 = vrot.slane %v348_v58, 2  ;;  %v373_v61 = vsel %vm372_vm3, %v370_v56, %v371_v57  ;;  %v298_v62 = vsel %vm297_vm4, %v295_v52, %v296_v55  ;;  %v324_v63 = vrot.slane %v323_v59, 1 }
 0x13a   :  { %v374_v0 = vrot.slane %v373_v61, 4  ;;  %vm299_vm5 = vcmp.eq.s32.totalorder %v1073_v6, %v298_v62  ;;  %vm300_vm8 = vcmp.eq.s32.totalorder %v1076_v19, %v298_v62  ;;  %vm393_vm15 = vcmask 1042432  }
 0x13b   :  { %vm350_vm7 = vcmp.lt.s32.totalorder %v348_v58, %v349_v60  ;;  %v670_v2 = vsel %vm299_vm5, 1.0, %v895_v1  ;;  %vm325_vm9 = vcmp.lt.s32.totalorder %v323_v59, %v324_v63  ;;  %v671_v11 = vsel %vm300_vm8, 1.0, %v895_v1 }
 0x13c   :  { %vm375_vm10 = vcmp.lt.s32.totalorder %v373_v61, %v374_v0  ;;  %396 = vxpose.xlu0.b32.start [1/8] (short) %v670_v2, 128  ;;  %v326_v3 = vsel %vm325_vm9, %v323_v59, %v324_v63  ;;  %v351_v4 = vsel %vm350_vm7, %v348_v58, %v349_v60  ;;  %vm428_vm7 = vcmask 523264  }
 0x13d   :  { %v376_v7 = vsel %vm375_vm10, %v373_v61, %v374_v0  ;;  %v390_v8 = vsel %vm389_vm6, %v298_v62, %v326_v3  ;;  %v352_v10 = vrot.slane %v351_v4, 1  ;;  %vm327_vm13 = vcmp.eq.s32.totalorder %v1073_v6, %v326_v3 }
 0x13e   :  { %v377_v9 = vrot.slane %v376_v7, 2  ;;  %v672_v16 = vsel %vm327_vm13, 1.0, %v895_v1  ;;  %vm328_vm1 = vcmp.eq.s32.totalorder %v1076_v19, %v326_v3 }
 0x13f   :  { %vm353_vm14 = vcmp.lt.s32.totalorder %v351_v4, %v352_v10  ;;  %v673_v17 = vsel %vm328_vm1, 1.0, %v895_v1 }
 0x140   :  { %vm378_vm12 = vcmp.lt.s32.totalorder %v376_v7, %v377_v9  ;;  %397 = vxpose.xlu0.b32.cont [2/8] (short) %v671_v11, 128  ;;  %v354_v12 = vsel %vm353_vm14, %v351_v4, %v352_v10 }
 0x141   :  { %v379_v13 = vsel %vm378_vm12, %v376_v7, %v377_v9  ;;  %v392_v14 = vsel %vm391_vm11, %v390_v8, %v354_v12  ;;  %vm355_vm3 = vcmp.eq.s32.totalorder %v1073_v6, %v354_v12  ;;  %vm356_vm4 = vcmp.eq.s32.totalorder %v1076_v19, %v354_v12 }
 0x142   :  { %v380_v15 = vrot.slane %v379_v13, 1  ;;  %v674_v18 = vsel %vm355_vm3, 1.0, %v895_v1  ;;  %v675_v20 = vsel %vm356_vm4, 1.0, %v895_v1 }
 0x144   :  { %398 = vxpose.xlu0.b32.cont [3/8] (short) %v672_v16, 128  ;;  %vm381_vm2 = vcmp.lt.s32.totalorder %v379_v13, %v380_v15 }
 0x145   :  { %v382_v40 = vsel %vm381_vm2, %v379_v13, %v380_v15 }
 0x146   :  { %v394_v41 = vsel %vm393_vm15, %v392_v14, %v382_v40  ;;  %vm383_vm5 = vcmp.eq.s32.totalorder %v1073_v6, %v382_v40  ;;  %vm384_vm6 = vcmp.eq.s32.totalorder %v1076_v19, %v382_v40 }
 0x147   :  { %395 = vst [vmem:[%s1182_s3] sm:$0xf] %v394_v41  ;;  %v676_v21 = vsel %vm383_vm5, 1.0, %v895_v1  ;;  %v677_v22 = vsel %vm384_vm6, 1.0, %v895_v1 }
 0x148   :  { %399 = vxpose.xlu0.b32.cont [4/8] (short) %v673_v17, 128 }
 0x14c   :  { %400 = vxpose.xlu0.b32.cont [5/8] (short) %v674_v18, 128 }
 0x150   :  { %401 = vxpose.xlu0.b32.cont [6/8] (short) %v675_v20, 128 }
 0x154   :  { %402 = vxpose.xlu0.b32.cont [7/8] (short) %v676_v21, 128 }
 0x158   :  { %403 = vxpose.xlu0.b32.end [8/8] (short) %v677_v22, 128 }
 0x1bc   :  { %v412_v23 = vpop.trf.xlu0 }
 0x1bd   :  { %802 = vmatprep.mubr.msk.f32.mxu1 %vm428_vm7, %v412_v23 }
 0x1c0   :  { %v413_v24 = vpop.trf.xlu0 }
 0x1c1   :  { %803 = vmatmul.mubr.msk.f32.vlgmr.msra.gmra.mrb[0].mxu1 %vm428_vm7, %v413_v24 }
 0x1c4   :  { %v414_v25 = vpop.trf.xlu0 }
 0x1c5   :  { %805 = vmatprep.mubr.msk.f32.mxu1 %vm428_vm7, %v414_v25 }
 0x1c8   :  { %v415_v26 = vpop.trf.xlu0 }
 0x1c9   :  { %806 = vmatmul.mubr.msk.f32.gmra.mrb[2].mxu1 %vm428_vm7, %v415_v26 }
 0x1cc   :  { %v416_v6 = vpop.trf.xlu0 }
 0x1cd   :  { %808 = vmatprep.mubr.msk.f32.mxu1 %vm428_vm7, %v416_v6 }
 0x1d0   :  { %v417_v27 = vpop.trf.xlu0 }
 0x1d1   :  { %809 = vmatmul.mubr.msk.f32.gmra.mrb[4].mxu1 %vm428_vm7, %v417_v27 }
 0x1d4   :  { %v418_v19 = vpop.trf.xlu0 }
 0x1d5   :  { %811 = vmatprep.mubr.msk.f32.mxu1 %vm428_vm7, %v418_v19 }
 0x1d8   :  { %v419_v28 = vpop.trf.xlu0 }
 0x1d9   :  { %812 = vmatmul.mubr.msk.f32.gmra.mrb[6].mxu1 %vm428_vm7, %v419_v28 }
 0x1dc   :  { %v420_v29 = vpop.trf.xlu0 }
 0x1dd   :  { %814 = vmatprep.mubr.msk.f32.mxu1 %vm428_vm7, %v420_v29 }
 0x1e0   :  { %v421_v30 = vpop.trf.xlu0 }
 0x1e1   :  { %815 = vmatmul.mubr.msk.f32.gmra.mrb[8].mxu1 %vm428_vm7, %v421_v30 }
 0x1e4   :  { %v422_v31 = vpop.trf.xlu0 }
 0x1e5   :  { %817 = vmatprep.mubr.msk.f32.mxu1 %vm428_vm7, %v422_v31 }
 0x1e8   :  { %v423_v32 = vpop.trf.xlu0 }
 0x1e9   :  { %818 = vmatmul.mubr.msk.f32.gmra.mrb[10].mxu1 %vm428_vm7, %v423_v32 }
 0x1ec   :  { %v424_v33 = vpop.trf.xlu0 }
 0x1ed   :  { %820 = vmatprep.mubr.msk.f32.mxu1 %vm428_vm7, %v424_v33 }
 0x1f0   :  { %v425_v34 = vpop.trf.xlu0 }
 0x1f1   :  { %821 = vmatmul.mubr.msk.f32.gmra.mrb[12].mxu1 %vm428_vm7, %v425_v34 }
 0x1f4   :  { %v426_v35 = vpop.trf.xlu0 }
 0x1f5   :  { %823 = vmatprep.mubr.msk.f32.mxu1 %vm428_vm7, %v426_v35 }
 0x1f8   :  { %v427_v36 = vpop.trf.xlu0 }
 0x1f9   :  { %824 = vmatmul.mubr.msk.f32.gmra.mrb[14].mxu1 %vm428_vm7, %v427_v36 }
 0x294   :  { %v804_v37 = vpop.f32.mrb[0].mxu1 }
 0x295   :  { %623 = vst.msk [vmem:[%s1183_s4 + $0x8] sm:$0xff] %vm48_vm0, %v804_v37  ;;  %v543_v38 = vpop.f32.mrb[1].mxu1 }
 0x296   :  { %622 = vst.msk [vmem:[%s1183_s4] sm:$0xff] %vm48_vm0, %v543_v38 }
 0x29c   :  { %v807_v39 = vpop.f32.mrb[2].mxu1 }
 0x29d   :  { %625 = vst.msk [vmem:[%s1183_s4 + $0x18] sm:$0xff] %vm48_vm0, %v807_v39  ;;  %v553_v42 = vpop.f32.mrb[3].mxu1 }
 0x29e   :  { %624 = vst.msk [vmem:[%s1183_s4 + $0x10] sm:$0xff] %vm48_vm0, %v553_v42 }
 0x2a4   :  { %v810_v43 = vpop.f32.mrb[4].mxu1 }
 0x2a5   :  { %627 = vst.msk [vmem:[%s1183_s4 + $0x28] sm:$0xff] %vm48_vm0, %v810_v43  ;;  %v563_v44 = vpop.f32.mrb[5].mxu1 }
 0x2a6   :  { %626 = vst.msk [vmem:[%s1183_s4 + $0x20] sm:$0xff] %vm48_vm0, %v563_v44 }
 0x2ac   :  { %v813_v45 = vpop.f32.mrb[6].mxu1 }
 0x2ad   :  { %629 = vst.msk [vmem:[%s1183_s4 + $0x38] sm:$0xff] %vm48_vm0, %v813_v45  ;;  %v573_v46 = vpop.f32.mrb[7].mxu1 }
 0x2ae   :  { %628 = vst.msk [vmem:[%s1183_s4 + $0x30] sm:$0xff] %vm48_vm0, %v573_v46 }
 0x2b4   :  { %v816_v47 = vpop.f32.mrb[8].mxu1 }
 0x2b5   :  { %631 = vst.msk [vmem:[%s1183_s4 + $0x48] sm:$0xff] %vm48_vm0, %v816_v47  ;;  %v583_v48 = vpop.f32.mrb[9].mxu1 }
 0x2b6   :  { %630 = vst.msk [vmem:[%s1183_s4 + $0x40] sm:$0xff] %vm48_vm0, %v583_v48 }
 0x2bc   :  { %v819_v49 = vpop.f32.mrb[10].mxu1 }
 0x2bd   :  { %633 = vst.msk [vmem:[%s1183_s4 + $0x58] sm:$0xff] %vm48_vm0, %v819_v49  ;;  %v593_v50 = vpop.f32.mrb[11].mxu1 }
 0x2be   :  { %632 = vst.msk [vmem:[%s1183_s4 + $0x50] sm:$0xff] %vm48_vm0, %v593_v50 }
 0x2c4   :  { %v822_v51 = vpop.f32.mrb[12].mxu1 }
 0x2c5   :  { %635 = vst.msk [vmem:[%s1183_s4 + $0x68] sm:$0xff] %vm48_vm0, %v822_v51  ;;  %v603_v52 = vpop.f32.mrb[13].mxu1 }
 0x2c6   :  { %634 = vst.msk [vmem:[%s1183_s4 + $0x60] sm:$0xff] %vm48_vm0, %v603_v52 }
 0x2cc   :  { %v825_v53 = vpop.f32.mrb[14].mxu1 }
 0x2cd   :  { %637 = vst.msk [vmem:[%s1183_s4 + $0x78] sm:$0xff] %vm48_vm0, %v825_v53  ;;  %v613_v54 = vpop.f32.mrb[15].mxu1 }
 0x2ce   :  { %636 = vst.msk [vmem:[%s1183_s4 + $0x70] sm:$0xff] %vm48_vm0, %v613_v54 }

</bundles_post_ra>
